<compile_context>
chip_gen: v6e
topology: v6e:2x2x1
jax: 0.10.0
libtpu: 0.0.40
codegen_flags: <defaults>
</compile_context>

<pallas_src>
import jax
import jax.numpy as jnp
from jax.experimental import pallas as pl
from jax.experimental.pallas import tpu as pltpu


def relation_network_kernel(x_ref, w1_ref, b1_ref, w2_ref, b2_ref, o_ref):
    # fc1: [TB, in](bf16) @ [in, hidden](bf16) -> f32 acc, + [1, hidden] bias, ReLU
    h = jnp.dot(x_ref[...], w1_ref[...], preferred_element_type=jnp.float32)
    h = jnp.maximum(h + b1_ref[...], 0.0)
    # fc2: [TB, hidden](f32) @ [hidden, 1](f32) -> f32, + scalar bias (SMEM), Sigmoid
    z = jnp.dot(h, w2_ref[...], preferred_element_type=jnp.float32) + b2_ref[0, 0]
    o_ref[...] = jax.nn.sigmoid(z).astype(o_ref.dtype)


def relation_network(x, w1, b1, w2, b2, *, tb=512):
    """x: [B, input_size] f32; w1: [input_size, hidden]; b1: [1, hidden];
    w2: [hidden, 1]; b2: [1, 1].  Returns [B, 1] f32."""
    B, input_size = x.shape
    hidden = w1.shape[1]

    # Halve HBM traffic on the streamed operand (and the resident fc1 weight);
    # MXU takes bf16 natively on v5e/v6e/v7x and accumulates in f32.
    x_bf = x.astype(jnp.bfloat16)
    w1_bf = w1.astype(jnp.bfloat16)
    b1_f = b1.astype(jnp.float32)
    w2_f = w2.astype(jnp.float32)
    b2_f = b2.astype(jnp.float32)

    # Batch tile: as large as `tb` (multiple of 8 sublanes); pad B up to a
    # multiple of the tile so every grid step sees a full block.
    if B >= tb:
        TB = tb
    else:
        TB = ((B + 7) // 8) * 8
    B_pad = pl.cdiv(B, TB) * TB
    if B_pad != B:
        x_bf = jnp.pad(x_bf, ((0, B_pad - B), (0, 0)))
    grid = (B_pad // TB,)

    out = pl.pallas_call(
        relation_network_kernel,
        out_shape=jax.ShapeDtypeStruct((B_pad, 1), jnp.float32),
        grid_spec=pltpu.PrefetchScalarGridSpec(
            num_scalar_prefetch=0,
            grid=grid,
            in_specs=[
                # streamed activations: one batch tile per grid step
                pl.BlockSpec((TB, input_size), lambda i: (i, 0)),
                # resident weights/bias: block index never changes -> no re-DMA
                pl.BlockSpec((input_size, hidden), lambda i: (0, 0)),
                pl.BlockSpec((1, hidden), lambda i: (0, 0)),
                pl.BlockSpec((hidden, 1), lambda i: (0, 0)),
                # scalar fc2 bias in SMEM (avoids a double-buffered (1,1) VMEM tile)
                pl.BlockSpec(memory_space=pltpu.MemorySpace.SMEM),
            ],
            out_specs=pl.BlockSpec((TB, 1), lambda i: (i, 0)),
        ),
        compiler_params=pltpu.CompilerParams(
            # batch axis is independent across tiles -> shard over v7x's 2 TCs
            dimension_semantics=("parallel",),
        ),
    )(x_bf, w1_bf, b1_f, w2_f, b2_f)
    return out[:B]


def init_params(key, input_size, hidden_size):
    """Deterministic init mimicking nn.Linear's U(-1/sqrt(fan_in), 1/sqrt(fan_in))."""
    k1, k2, k3, k4 = jax.random.split(key, 4)
    bound1 = 1.0 / jnp.sqrt(input_size)
    bound2 = 1.0 / jnp.sqrt(hidden_size)
    # store weights pre-transposed: [in, out]
    w1 = jax.random.uniform(k1, (input_size, hidden_size), jnp.float32, -bound1, bound1)
    b1 = jax.random.uniform(k2, (1, hidden_size), jnp.float32, -bound1, bound1)
    w2 = jax.random.uniform(k3, (hidden_size, 1), jnp.float32, -bound2, bound2)
    b2 = jax.random.uniform(k4, (1, 1), jnp.float32, -bound2, bound2)
    return w1, b1, w2, b2


if __name__ == "__main__":
    input_size = 32
    hidden_size = 16
    batch = 100  # not a multiple of the tile -> exercises padding + multi-tile grid

    key = jax.random.PRNGKey(0)
    kx, kp = jax.random.split(key)
    x = jax.random.normal(kx, (batch, input_size), jnp.float32)
    w1, b1, w2, b2 = init_params(kp, input_size, hidden_size)

    # Small tile here just to exercise the multi-step pipelined grid; real use
    # should batch all relation pairs and leave tb at 512+.
    out = relation_network(x, w1, b1, w2, b2, tb=32)
    out = jax.block_until_ready(out)

    # reference check in plain JAX (with the same bf16 cast on x / w1)
    x32 = x.astype(jnp.bfloat16).astype(jnp.float32)
    w132 = w1.astype(jnp.bfloat16).astype(jnp.float32)
    ref = jax.nn.sigmoid(jnp.maximum(x32 @ w132 + b1, 0.0) @ w2 + b2)
    assert out.shape == (batch, 1)
    assert jnp.allclose(out, ref, atol=1e-4, rtol=1e-4)
    print("KERNEL_OK")
</pallas_src>

<mosaic_0001>
module attributes {stable_mosaic.version = 11 : i64} {
  func.func @relation_network_kernel(%arg0: i32, %arg1: memref<32x32xbf16, #tpu.memory_space<vmem>>, %arg2: memref<32x16xbf16, #tpu.memory_space<vmem>>, %arg3: memref<1x16xf32, #tpu.memory_space<vmem>>, %arg4: memref<16x1xf32, #tpu.memory_space<vmem>>, %arg5: memref<1x1xf32, #tpu.memory_space<smem>>, %arg6: memref<32x1xf32, #tpu.memory_space<vmem>>) attributes {dimension_semantics = [#tpu.dimension_semantics<parallel>], iteration_bounds = array<i64: 4>, scalar_prefetch = 0 : i64, scratch_operands = 0 : i64, tpu.core_type = #tpu.core_type<tc>, window_params = [{transform_indices = @transform_0, window_bounds = array<i64: 32, 32>}, {pipeline_mode = #tpu.pipeline_mode<synchronous>, transform_indices = @transform_1, window_bounds = array<i64: 32, 16>}, {pipeline_mode = #tpu.pipeline_mode<synchronous>, transform_indices = @transform_2, window_bounds = array<i64: 1, 16>}, {pipeline_mode = #tpu.pipeline_mode<synchronous>, transform_indices = @transform_3, window_bounds = array<i64: 16, 1>}, {transform_indices = @transform_4, window_bounds = array<i64: 1, 1>}, {transform_indices = @transform_5, window_bounds = array<i64: 32, 1>}]} {
    %c0 = arith.constant 0 : index
    %c0_0 = arith.constant 0 : index
    %0 = vector.load %arg1[%c0, %c0_0] : memref<32x32xbf16, #tpu.memory_space<vmem>>, vector<32x32xbf16>
    %c0_1 = arith.constant 0 : index
    %c0_2 = arith.constant 0 : index
    %1 = vector.load %arg2[%c0_1, %c0_2] : memref<32x16xbf16, #tpu.memory_space<vmem>>, vector<32x16xbf16>
    %cst = arith.constant dense<0.000000e+00> : vector<32x16xf32>
    %2 = tpu.matmul %0, %1, %cst {dimension_numbers = #tpu.dot_dimension_numbers<[1], [0], [0], [1], [0, 0, 1, 1], [], []>} : vector<32x32xbf16>, vector<32x16xbf16>, vector<32x16xf32> -> vector<32x16xf32>
    %c0_3 = arith.constant 0 : index
    %c0_4 = arith.constant 0 : index
    %3 = vector.load %arg3[%c0_3, %c0_4] : memref<1x16xf32, #tpu.memory_space<vmem>>, vector<1x16xf32>
    %4 = vector.broadcast %3 : vector<1x16xf32> to vector<32x16xf32>
    %5 = arith.addf %2, %4 : vector<32x16xf32>
    %cst_5 = arith.constant 0.000000e+00 : f32
    %6 = vector.broadcast %cst_5 : f32 to vector<32x16xf32>
    %7 = arith.maximumf %5, %6 : vector<32x16xf32>
    %c0_6 = arith.constant 0 : index
    %c0_7 = arith.constant 0 : index
    %8 = vector.load %arg4[%c0_6, %c0_7] : memref<16x1xf32, #tpu.memory_space<vmem>>, vector<16x1xf32>
    %cst_8 = arith.constant dense<0.000000e+00> : vector<32x1xf32>
    %9 = tpu.matmul %7, %8, %cst_8 {dimension_numbers = #tpu.dot_dimension_numbers<[1], [0], [0], [1], [0, 0, 1, 1], [], []>} : vector<32x16xf32>, vector<16x1xf32>, vector<32x1xf32> -> vector<32x1xf32>
    %c0_9 = arith.constant 0 : index
    %c0_10 = arith.constant 0 : index
    %10 = memref.load %arg5[%c0_9, %c0_10] : memref<1x1xf32, #tpu.memory_space<smem>>
    %11 = vector.broadcast %10 : f32 to vector<32x1xf32>
    %12 = arith.addf %9, %11 : vector<32x1xf32>
    %13 = arith.negf %12 : vector<32x1xf32>
    %14 = math.exp %13 : vector<32x1xf32>
    %cst_11 = arith.constant 1.000000e+00 : f32
    %15 = vector.broadcast %cst_11 : f32 to vector<32x1xf32>
    %16 = arith.addf %15, %14 : vector<32x1xf32>
    %17 = arith.divf %15, %16 : vector<32x1xf32>
    %c0_12 = arith.constant 0 : index
    %c0_13 = arith.constant 0 : index
    %18 = vector.load %arg6[%c0_12, %c0_13] : memref<32x1xf32, #tpu.memory_space<vmem>>, vector<32x1xf32>
    tpu.vector_store %arg6[%c0_12, %c0_13], %17 {strides = array<i32>} : memref<32x1xf32, #tpu.memory_space<vmem>>, vector<32x1xf32>,
    return
  }
  func.func @transform_0(%arg0: i32) -> (i32, i32) {
    %c0_i32 = arith.constant 0 : i32
    %c0_i32_0 = arith.constant 0 : i32
    return %arg0, %c0_i32 : i32, i32
  }
  func.func @transform_1(%arg0: i32) -> (i32, i32) {
    %c0_i32 = arith.constant 0 : i32
    %c0_i32_0 = arith.constant 0 : i32
    %c0_i32_1 = arith.constant 0 : i32
    return %c0_i32, %c0_i32_0 : i32, i32
  }
  func.func @transform_2(%arg0: i32) -> (i32, i32) {
    %c0_i32 = arith.constant 0 : i32
    %c0_i32_0 = arith.constant 0 : i32
    %c0_i32_1 = arith.constant 0 : i32
    return %c0_i32, %c0_i32_0 : i32, i32
  }
  func.func @transform_3(%arg0: i32) -> (i32, i32) {
    %c0_i32 = arith.constant 0 : i32
    %c0_i32_0 = arith.constant 0 : i32
    %c0_i32_1 = arith.constant 0 : i32
    return %c0_i32, %c0_i32_0 : i32, i32
  }
  func.func @transform_4(%arg0: i32) -> (i32, i32) {
    %c0_i32 = arith.constant 0 : i32
    %c0_i32_0 = arith.constant 0 : i32
    %c0_i32_1 = arith.constant 0 : i32
    return %c0_i32, %c0_i32_0 : i32, i32
  }
  func.func @transform_5(%arg0: i32) -> (i32, i32) {
    %c0_i32 = arith.constant 0 : i32
    %c0_i32_0 = arith.constant 0 : i32
    return %arg0, %c0_i32 : i32, i32
  }
}

</mosaic_0001>

<bundles_post_ra>
// kernel: tpu_custom_call.1
= control target key start
LH: loop header
LB: loop body
LE: loop exit
PB: predicated region body
PF: predicated region fallthrough
CT: control target
= control target key end

     0   :  { %s637_s20 = smov 0   ;;  %s673_s0 = inlined_call_operand.vmem [shape: bf16[128,32], index: 0, kind: input, shape index: {}]   ;;  %s674_s1 = inlined_call_operand.vmem [shape: bf16[32,16], index: 1, kind: input, shape index: {}]   ;;  %s675_s2 = inlined_call_operand.vmem [shape: f32[1,16], index: 2, kind: input, shape index: {}]   ;;  %s676_s3 = inlined_call_operand.vmem [shape: f32[16,1], index: 3, kind: input, shape index: {}]   ;;  %s677_s4 = inlined_call_operand.<no memory space> [shape: f32[1,1], index: 4, kind: input, shape index: {}]   ;;  %s678_s5 = inlined_call_operand.vmem [shape: f32[128,1], index: 5, kind: output, shape index: {}]  }
   0x1   :  { %10 = sst [smem:[#allocation2]] %s677_s4 }
   0x2 LB: > { %s514_s21 = sadd.s32 4294967295, %s602_s20   ;;  %p518_p0 = scmp.ge.s32.totalorder %s602_s20, 1  ;;  %s602_s20 = sphi %s637_s20, %s16_s20  }
   0x3   : > { %p189_p1 = scmp.lt.s32.totalorder %s602_s20, 5 }
   0x5   : > { %p190_p2 = pnand %p518_p0, %p189_p1 }
   0x6   : > { %s519_s4 = sshll.u32 (!%p190_p2), %s514_s21, 2  ;;  %s329_s11 = sld [smem:[#allocation2]] (!%p190_p2) }
   0x7   : > { %193 = sbr.rel (%p190_p2) target bundleno = 458 (0x1ca), region = 40  ;;  %p218_p3 = scmp.lt.s32.totalorder (!%p190_p2), %s519_s4, 15 }
   0xc   : > { %v576_v0 = vld [vmem:[%s674_s1 + $0x8] sm:$0xff]   ;;  %v577_v1 = vld [vmem:[%s674_s1] sm:$0xff]   ;;  %s680_s4 = smov (!%p218_p3, %s519_s4), 15  ;;  %vm267_vm0 = vcmask 261120   ;;  %vm331_vm1 = vcmask 130048   ;;  %v330_v19 = vstv %s329_s11  ;;  %vm453_vm2 = vcmask 7168  }
   0xd   : > { %550 = vmatprep.subr.bf16.mxu0 %v576_v0  ;;  %s520_s26 = sshll.u32 %s680_s4, 2  ;;  %v328_v4 = vld [vmem:[%s676_s3 + $0x8] sm:$0xff]  ;;  %v327_v5 = vld [vmem:[%s676_s3] sm:$0xff]  ;;  %s522_s12 = sshll.u32 %s680_s4, 3 }
   0xe   : > { %551 = vmatpush3.bf16.msra.mxu0 %v576_v0  ;;  %s221_s29 = scalar_lea.vmem %s673_s0, %s520_s26  ;;  %558 = vmatprep.subr.mxu1 %v328_v4  ;;  %v523_v7 = vld [vmem:[%s675_s2] ss:$0 sm:$0xff]  ;;  %s227_s15 = scalar_lea.vmem %s678_s5, %s522_s12 }
   0xf   : > { %552 = vmatprep.subr.bf16.mxu0 %v577_v1  ;;  %v578_v2 = vld [vmem:[%s221_s29] sm:$0xff]   ;;  %v579_v3 = vld [vmem:[%s221_s29 + $0x8] sm:$0xff]   ;;  %559 = vmatpush3.msra.mxu1 %v328_v4 }
  0x10   : > { %554 = vmatprep.mubr.msk.bf16.mxu0 %vm267_vm0, %v578_v2  ;;  %560 = vmatprep.subr.mxu1 %v327_v5 }
  0x11   : > { %561 = vmatpush3.msra.mxu1 %v327_v5 }
  0x12   : > { %553 = vmatpush3.bf16.msra.mxu0 %v577_v1 }
  0x15   : > { %555 = vmatmul.mubr.msk.bf16.vlgmr.msra.gmra.mxu0 %vm267_vm0, %v579_v3 }
  0xd5   : > { %v556_v6 = vpop.f32.mrf.mxu0 }
  0xd6   : > { %v317_v12 = vadd.f32 %v556_v6, %v523_v7 }
  0xd7   : > { %v308_v8 = vpop.f32.mrf.mxu0 }
  0xd8   : > { %v309_v9 = vadd.f32 %v523_v7, %v308_v8  ;;  %v325_v17 = vmax.f32 %v317_v12, 0.0 }
  0xd9   : > { %v557_v10 = vpop.f32.mrf.mxu0 }
  0xda   : > { %v323_v11 = vmax.f32 %v309_v9, 0.0  ;;  %v320_v15 = vadd.f32 %v557_v10, %v523_v7 }
  0xdb   : > { %v311_v13 = vpop.f32.mrf.mxu0 }
  0xdc   : > { %v312_v14 = vadd.f32 %v523_v7, %v311_v13  ;;  %562 = vmatprep.mubr.msk.f32.mxu1 %vm331_vm1, %v323_v11  ;;  %v326_v18 = vmax.f32 %v320_v15, 0.0 }
  0xde   : > { %v324_v16 = vmax.f32 %v312_v14, 0.0 }
  0xe0   : > { %563 = vmatmul.mubr.msk.f32.vlgmr.msra.gmra.mxu1 %vm331_vm1, %v324_v16 }
  0xe1   : > { %565 = vmatprep.mubr.msk.f32.mxu1 %vm331_vm1, %v325_v17 }
  0xe4   : > { %566 = vmatmul.mubr.msk.f32.gmra.mxu1 %vm331_vm1, %v326_v18 }
 0x1a0   : > { %v564_v20 = vpop.f32.mrf.mxu1 }
 0x1a1   : > { %v416_v21 = vadd.f32 %v564_v20, %v330_v19 }
 0x1a2   : > { %v410_v22 = vpop.f32.mrf.mxu1 }
 0x1a3   : > { %v535_v23 = vmul.f32 -1.442695, %v416_v21  ;;  %v411_v24 = vadd.f32 %v410_v22, %v330_v19 }
 0x1a4   : > { %v567_v25 = vpop.f32.mrf.mxu1 }
 0x1a5   : > { %580 = vpow2.f32 %v535_v23  ;;  %v534_v26 = vmul.f32 -1.442695, %v411_v24  ;;  %v426_v27 = vadd.f32 %v567_v25, %v330_v19 }
 0x1a6   : > { %v420_v28 = vpop.f32.mrf.mxu1 }
 0x1a7   : > { %582 = vpow2.f32 %v534_v26  ;;  %v537_v29 = vmul.f32 -1.442695, %v426_v27  ;;  %v421_v30 = vadd.f32 %v420_v28, %v330_v19 }
 0x1a9   : > { %584 = vpow2.f32 %v537_v29  ;;  %v536_v31 = vmul.f32 -1.442695, %v421_v30 }
 0x1ab   : > { %586 = vpow2.f32 %v536_v31 }
 0x1b2   : > { %v581_v32 = vpop.eup %580 }
 0x1b3   : > { %v442_v33 = vadd.f32 1.0, %v581_v32 }
 0x1b4   : > { %v583_v34 = vpop.eup %582 }
 0x1b5   : > { %588 = vrcp.f32 %v442_v33  ;;  %v441_v35 = vadd.f32 1.0, %v583_v34 }
 0x1b6   : > { %v585_v36 = vpop.eup %584 }
 0x1b7   : > { %590 = vrcp.f32 %v441_v35  ;;  %v444_v37 = vadd.f32 1.0, %v585_v36 }
 0x1b8   : > { %v587_v38 = vpop.eup %586 }
 0x1b9   : > { %592 = vrcp.f32 %v444_v37  ;;  %v443_v39 = vadd.f32 1.0, %v587_v38 }
 0x1bb   : > { %594 = vrcp.f32 %v443_v39 }
 0x1c2   : > { %v589_v40 = vpop.eup %588 }
 0x1c3   : > { %455 = vst.msk [vmem:[%s227_s15 + $0x8] sm:$0xff] %vm453_vm2, %v589_v40 }
 0x1c4   : > { %v591_v41 = vpop.eup %590 }
 0x1c5   : > { %454 = vst.msk [vmem:[%s227_s15] sm:$0xff] %vm453_vm2, %v591_v41 }
 0x1c6   : > { %v593_v42 = vpop.eup %592 }
 0x1c7   : > { %457 = vst.msk [vmem:[%s227_s15 + $0x18] sm:$0xff] %vm453_vm2, %v593_v42 }
 0x1c8   : > { %v595_v43 = vpop.eup %594 }
 0x1c9   : > { %456 = vst.msk [vmem:[%s227_s15 + $0x10] sm:$0xff] %vm453_vm2, %v595_v43 }
 0x1ca PF: > { %s16_s20 = sadd.s32 1, %s602_s20  }
 0x1cb   : > { %p13_p4 = scmp.ge.s32.totalorder %s16_s20, 6  }
 0x1cd   :  { %15 = sbr.rel (!%p13_p4) target bundleno = 2 (0x2), region = 70 }

</bundles_post_ra>
